<compile_context>
chip_gen: v7x
topology: tpu7x:2x2x1
jax: 0.10.0
libtpu: 0.0.40
codegen_flags: <defaults>
</compile_context>

<pallas_src>
import functools

import jax
import jax.numpy as jnp
from jax import lax
from jax.experimental import pallas as pl
from jax.experimental.pallas import tpu as pltpu


def _vq_kernel(x_ref, embed_ref, half_e_sq_ref, q_ref, idx_ref):
    """One tile of rows: score -> packed-key argmin -> one-hot @ embed.T (MXU)."""
    x = x_ref[...]                       # (tm, e_dim)
    embed = embed_ref[...]               # (e_dim, n_embed) f32
    half_e_sq = half_e_sq_ref[...]       # (1, n_embed) == 0.5 * sum(embed**2, 0)

    # 0.5*||x - e||^2 = 0.5*||x||^2 + (0.5*||e||^2 - x.e); the per-row term is
    # constant across codes, so argmin(score) == argmin of the true distance.
    dot = jnp.dot(x, embed, preferred_element_type=jnp.float32)   # (tm, n_embed)
    score = half_e_sq - dot

    tm, n_embed = score.shape
    idx_bits = max(1, (n_embed - 1).bit_length())
    lane_mask = (1 << idx_bits) - 1

    # Monotone f32 -> signed-int32 sort key; replace the low idx_bits with the
    # lane index so a single lane-reduce min returns the first-occurrence
    # argmin (one XLU reduce instead of two + a compare/select pass).
    bits = pltpu.bitcast(score, jnp.int32)
    key = bits ^ ((bits >> 31) & jnp.int32(0x7FFFFFFF))
    iota = lax.broadcasted_iota(jnp.int32, (tm, n_embed), 1)
    packed = (key & jnp.int32(~lane_mask)) | iota
    idx = jnp.min(packed, axis=1, keepdims=True) & jnp.int32(lane_mask)  # (tm, 1)

    # One-hot gather of codebook rows via MXU matmul: onehot @ embed.T.
    onehot = (iota == idx).astype(jnp.float32)                    # (tm, n_embed)
    q = lax.dot_general(onehot, embed,
                        dimension_numbers=(((1,), (1,)), ((), ())),
                        preferred_element_type=jnp.float32)       # (tm, e_dim)

    q_ref[...] = q.astype(q_ref.dtype)
    idx_ref[...] = idx.reshape(idx_ref.shape)                     # (1, tm//128, 128)


@jax.custom_vjp
def _straight_through(x, q):
    # forward value is exactly `quantize`; gradient flows to x only.
    return q


def _straight_through_fwd(x, q):
    return q, None


def _straight_through_bwd(_, g):
    return g, jnp.zeros_like(g)


_straight_through.defvjp(_straight_through_fwd, _straight_through_bwd)


def _round_up(v, m):
    return ((v + m - 1) // m) * m


@functools.partial(jax.jit, static_argnames=("tm",))
def vector_quantize_forward(embed, x, tm=4096):
    """Pallas implementation of vq_forward (return_dict=False tuple)."""
    e_dim, n_embed = embed.shape
    orig_shape = x.shape
    assert orig_shape[-1] == e_dim
    flat = x.reshape(-1, e_dim)
    n_rows = flat.shape[0]

    # Row tile: multiple of 128, as large as the cap to amortize the fixed
    # per-grid-step cost, but clamped so mid-sized N still gives >= 2 grid
    # steps (megacore sharding across v7x's two TensorCores).
    tm_cap = max(128, (int(tm) // 128) * 128)
    rows_half = _round_up(max(1, (n_rows + 1) // 2), 128)
    tm = max(128, min(tm_cap, rows_half))
    n_tiles = pl.cdiv(n_rows, tm)
    sub = tm // 128

    # Hoist constant distance terms out of the kernel (tiny, computed once).
    embed_f32 = embed.astype(jnp.float32)
    half_e_sq = 0.5 * jnp.sum(embed_f32 * embed_f32, axis=0, keepdims=True)

    q_flat, idx_tiles = pl.pallas_call(
        _vq_kernel,
        out_shape=(
            jax.ShapeDtypeStruct((n_rows, e_dim), embed.dtype),
            jax.ShapeDtypeStruct((n_tiles, sub, 128), jnp.int32),
        ),
        grid=(n_tiles,),
        in_specs=[
            pl.BlockSpec((tm, e_dim), lambda i: (i, 0)),
            pl.BlockSpec((e_dim, n_embed), lambda i: (0, 0)),
            pl.BlockSpec((1, n_embed), lambda i: (0, 0)),
        ],
        out_specs=(
            pl.BlockSpec((tm, e_dim), lambda i: (i, 0)),
            pl.BlockSpec((1, sub, 128), lambda i: (i, 0, 0)),
        ),
        compiler_params=pltpu.CompilerParams(
            dimension_semantics=("parallel",),
            vmem_limit_bytes=48 * 1024 * 1024),
    )(flat, embed_f32, half_e_sq)

    quantize = q_flat.reshape(orig_shape)
    # Only the tiny int32 index array carries padding; its slice is 4 B/row.
    embed_idxs = idx_tiles.reshape(-1)[:n_rows].reshape(orig_shape[:-1])
    # straight-through estimator: value == quantize, gradient flows to input.
    quantize_input_grad = _straight_through(x, quantize)
    return quantize, x, quantize_input_grad, embed_idxs, embed


def vq_forward_ref(embed, x):
    """Plain-JAX reference mirroring the PyTorch vq_forward."""
    e_dim, n_embed = embed.shape
    flat = x.reshape(-1, e_dim)
    dist = (jnp.sum(flat ** 2, axis=1, keepdims=True)
            - 2.0 * flat @ embed
            + jnp.sum(embed ** 2, axis=0, keepdims=True))
    idx = jnp.argmax(-dist, axis=1)
    quantize = embed.T[idx].reshape(x.shape)
    return quantize, idx.reshape(x.shape[:-1]), dist


if __name__ == "__main__":
    # Module config: e_dim=32, n_embed=128 (vec_dim=None path).
    e_dim, n_embed = 32, 128
    key = jax.random.PRNGKey(0)
    k_embed, k_x = jax.random.split(key)

    # Deterministic "buffer" init: uniform(-1/n_embed, 1/n_embed), shape (e_dim, n_embed).
    embed = jax.random.uniform(
        k_embed, (e_dim, n_embed), dtype=jnp.float32,
        minval=-1.0 / n_embed, maxval=1.0 / n_embed)

    # Input (..., e_dim): batch=2, seq=8, e_dim=32.
    x = jax.random.normal(k_x, (2, 8, e_dim), dtype=jnp.float32)

    out = vector_quantize_forward(embed, x, tm=4096)
    out = jax.block_until_ready(out)
    quantize, inp, quantize_st, embed_idxs, embed_out = out

    # Sanity check against plain-JAX reference.
    q_ref, idx_ref_shaped, dist = vq_forward_ref(embed, x)
    idx_ref = idx_ref_shaped.reshape(-1)

    assert quantize.shape == x.shape
    assert embed_idxs.shape == x.shape[:-1]
    assert embed_idxs.dtype == jnp.int32

    flat_idx = embed_idxs.reshape(-1)
    d_chosen = jnp.take_along_axis(dist, flat_idx[:, None], axis=1)[:, 0]
    d_min = jnp.min(dist, axis=1)
    # The chosen code must minimize the reference distance (tolerance covers
    # the mathematically-equivalent score formulation and the 7-bit tie
    # truncation of the packed-key argmin).
    assert bool(jnp.all(d_chosen <= d_min + 2e-5))
    # Where the winner is unambiguous, indices match the reference exactly.
    second = jnp.min(
        jnp.where(jnp.arange(n_embed)[None, :] == idx_ref[:, None], jnp.inf, dist),
        axis=1)
    unambiguous = (second - d_min) > 1e-4
    assert bool(jnp.all(jnp.where(unambiguous, flat_idx == idx_ref, True)))
    # quantize is exactly the selected codebook vectors.
    assert bool(jnp.allclose(quantize, embed.T[flat_idx].reshape(x.shape), atol=1e-6))
    assert bool(jnp.allclose(quantize_st, quantize, atol=1e-6))
    assert bool(jnp.allclose(inp, x))
    assert bool(jnp.allclose(embed_out, embed))

    print("KERNEL_OK")
</pallas_src>

<mosaic_0001>
module attributes {stable_mosaic.version = 11 : i64} {
  func.func @_vq_kernel(%arg0: i32, %arg1: memref<128x32xf32, #tpu.memory_space<vmem>>, %arg2: memref<32x128xf32, #tpu.memory_space<vmem>>, %arg3: memref<1x128xf32, #tpu.memory_space<vmem>>, %arg4: memref<128x32xf32, #tpu.memory_space<vmem>>, %arg5: memref<1x1x128xi32, #tpu.memory_space<vmem>>) attributes {dimension_semantics = [#tpu.dimension_semantics<parallel>], iteration_bounds = array<i64: 1>, scalar_prefetch = 0 : i64, scratch_operands = 0 : i64, tpu.core_type = #tpu.core_type<tc>, window_params = [{transform_indices = @transform_0, window_bounds = array<i64: 128, 32>}, {pipeline_mode = #tpu.pipeline_mode<synchronous>, transform_indices = @transform_1, window_bounds = array<i64: 32, 128>}, {pipeline_mode = #tpu.pipeline_mode<synchronous>, transform_indices = @transform_2, window_bounds = array<i64: 1, 128>}, {transform_indices = @transform_3, window_bounds = array<i64: 128, 32>}, {transform_indices = @transform_4, window_bounds = array<i64: 1, 1, 128>}]} {
    %c0 = arith.constant 0 : index
    %c0_0 = arith.constant 0 : index
    %0 = vector.load %arg1[%c0, %c0_0] : memref<128x32xf32, #tpu.memory_space<vmem>>, vector<128x32xf32>
    %c0_1 = arith.constant 0 : index
    %c0_2 = arith.constant 0 : index
    %1 = vector.load %arg2[%c0_1, %c0_2] : memref<32x128xf32, #tpu.memory_space<vmem>>, vector<32x128xf32>
    %c0_3 = arith.constant 0 : index
    %c0_4 = arith.constant 0 : index
    %2 = vector.load %arg3[%c0_3, %c0_4] : memref<1x128xf32, #tpu.memory_space<vmem>>, vector<1x128xf32>
    %cst = arith.constant dense<0.000000e+00> : vector<128x128xf32>
    %3 = tpu.matmul %0, %1, %cst {dimension_numbers = #tpu.dot_dimension_numbers<[1], [0], [0], [1], [0, 0, 1, 1], [], []>} : vector<128x32xf32>, vector<32x128xf32>, vector<128x128xf32> -> vector<128x128xf32>
    %4 = vector.broadcast %2 : vector<1x128xf32> to vector<128x128xf32>
    %5 = arith.subf %4, %3 : vector<128x128xf32>
    %6 = tpu.bitcast %5 : vector<128x128xf32> -> vector<128x128xi32>
    %c31_i32 = arith.constant 31 : i32
    %7 = vector.broadcast %c31_i32 : i32 to vector<128x128xi32>
    %8 = arith.shrsi %6, %7 : vector<128x128xi32>
    %c2147483647_i32 = arith.constant 2147483647 : i32
    %9 = vector.broadcast %c2147483647_i32 : i32 to vector<128x128xi32>
    %10 = arith.andi %8, %9 : vector<128x128xi32>
    %11 = arith.xori %6, %10 : vector<128x128xi32>
    %12 = tpu.iota {dimensions = array<i32: 1>} : vector<128x128xi32>
    %c-128_i32 = arith.constant -128 : i32
    %13 = vector.broadcast %c-128_i32 : i32 to vector<128x128xi32>
    %14 = arith.andi %11, %13 : vector<128x128xi32>
    %15 = arith.ori %14, %12 : vector<128x128xi32>
    %cst_5 = arith.constant dense<2147483647> : vector<128xi32>
    %16 = vector.multi_reduction <minsi>, %15, %cst_5 [1] : vector<128x128xi32> to vector<128xi32>
    %17 = vector.shape_cast %16 : vector<128xi32> to vector<128x1xi32>
    %c127_i32 = arith.constant 127 : i32
    %18 = vector.broadcast %c127_i32 : i32 to vector<128x1xi32>
    %19 = arith.andi %17, %18 : vector<128x1xi32>
    %20 = vector.broadcast %19 : vector<128x1xi32> to vector<128x128xi32>
    %21 = arith.cmpi eq, %12, %20 : vector<128x128xi32>
    %22 = arith.extui %21 : vector<128x128xi1> to vector<128x128xi32>
    %23 = arith.sitofp %22 : vector<128x128xi32> to vector<128x128xf32>
    %cst_6 = arith.constant dense<0.000000e+00> : vector<128x32xf32>
    %24 = tpu.matmul %23, %1, %cst_6 {dimension_numbers = #tpu.dot_dimension_numbers<[1], [1], [0], [0], [0, 0, 1, 0], [], []>} : vector<128x128xf32>, vector<32x128xf32>, vector<128x32xf32> -> vector<128x32xf32>
    %c0_7 = arith.constant 0 : index
    %c0_8 = arith.constant 0 : index
    %25 = vector.load %arg4[%c0_7, %c0_8] : memref<128x32xf32, #tpu.memory_space<vmem>>, vector<128x32xf32>
    tpu.vector_store %arg4[%c0_7, %c0_8], %24 {strides = array<i32>} : memref<128x32xf32, #tpu.memory_space<vmem>>, vector<128x32xf32>,
    %26 = vector.shape_cast %19 : vector<128x1xi32> to vector<1x1x128xi32>
    %c0_9 = arith.constant 0 : index
    %c0_10 = arith.constant 0 : index
    %c0_11 = arith.constant 0 : index
    %27 = vector.load %arg5[%c0_9, %c0_10, %c0_11] : memref<1x1x128xi32, #tpu.memory_space<vmem>>, vector<1x1x128xi32>
    tpu.vector_store %arg5[%c0_9, %c0_10, %c0_11], %26 {strides = array<i32>} : memref<1x1x128xi32, #tpu.memory_space<vmem>>, vector<1x1x128xi32>,
    return
  }
  func.func @transform_0(%arg0: i32) -> (i32, i32) {
    %c0_i32 = arith.constant 0 : i32
    %c0_i32_0 = arith.constant 0 : i32
    return %arg0, %c0_i32 : i32, i32
  }
  func.func @transform_1(%arg0: i32) -> (i32, i32) {
    %c0_i32 = arith.constant 0 : i32
    %c0_i32_0 = arith.constant 0 : i32
    %c0_i32_1 = arith.constant 0 : i32
    return %c0_i32, %c0_i32_0 : i32, i32
  }
  func.func @transform_2(%arg0: i32) -> (i32, i32) {
    %c0_i32 = arith.constant 0 : i32
    %c0_i32_0 = arith.constant 0 : i32
    %c0_i32_1 = arith.constant 0 : i32
    return %c0_i32, %c0_i32_0 : i32, i32
  }
  func.func @transform_3(%arg0: i32) -> (i32, i32) {
    %c0_i32 = arith.constant 0 : i32
    %c0_i32_0 = arith.constant 0 : i32
    return %arg0, %c0_i32 : i32, i32
  }
  func.func @transform_4(%arg0: i32) -> (i32, i32, i32) {
    %c0_i32 = arith.constant 0 : i32
    %c0_i32_0 = arith.constant 0 : i32
    %c0_i32_1 = arith.constant 0 : i32
    return %arg0, %c0_i32, %c0_i32_0 : i32, i32, i32
  }
}

</mosaic_0001>

<bundles_post_ra>
// kernel: vector_quantize_forward.1
= control target key start
LH: loop header
LB: loop body
LE: loop exit
PB: predicated region body
PF: predicated region fallthrough
CT: control target
= control target key end

     0   :  { %10 = vsyncpa [#allocation3], 0  ;;  %s1731_s0 = inlined_call_operand.hbm [shape: f32[16,32], index: 0, kind: input, shape index: {}]   ;;  %s1732_s1 = inlined_call_operand.vmem [shape: f32[32,128], index: 1, kind: input, shape index: {}]   ;;  %s1733_s2 = inlined_call_operand.vmem [shape: f32[1,128], index: 2, kind: input, shape index: {}]   ;;  %s1734_s3 = inlined_call_operand.vmem [shape: f32[16,32], index: 3, kind: output, shape index: {0}]   ;;  %s1735_s4 = inlined_call_operand.vmem [shape: s32[1,1,128], index: 4, kind: output, shape index: {1}]  }
   0x1   :  { %15 = vsyncadd [#allocation3], 1792  ;;  %s1174_s15 = smov [#allocation2]   ;;  %s1150_s19 = scalar_lea.hbm %s1731_s0, 256 }
   0x2   :  { %s16_s16 = sshll.u32 %s1174_s15, 4  ;;  %p1151_p0 = scmp.ne.s32.totalorder %s1731_s0, %s1150_s19  ;;  %s17_s16 = int_to_ptr.vmem [resolvable:$true] %s16_s16 }
   0x3   :  { %p1154_p1 = scmp.lt.u32.totalorder %s1150_s19, %s1731_s0 }
   0x5   :  { %p1156_p2 = pnand %p1154_p1, %p1151_p0 }
   0x7   :  { %1159 = shalt.err (!%p1156_p2)
}
   0x8   :  { %s1160_s24 = scalar_lea.vmem %s17_s16, 256  ;;  %s1164_s25 = scalar_lea.vmem %s17_s16, 2048 }
   0x9   :  { %p1161_p3 = scmp.ne.s32.totalorder %s17_s16, %s1160_s24  ;;  %p1165_p4 = scmp.lt.s32.totalorder %s17_s16, %s17_s16 }
   0xa   :  { %p1166_p5 = scmp.lt.s32.totalorder %s1164_s25, %s1160_s24 }
   0xc   :  { %p1167_p6 = por %p1166_p5, %p1165_p4 }
   0xe   :  { %p1168_p7 = pnand %p1167_p6, %p1161_p3 }
  0x10   :  { %1171 = shalt.err (!%p1168_p7)
}
  0x11   :  { %s1175_s26 = smov 128   ;;  %s1176_s27 = smov 8  }
  0x12   :  { %22 = dma.hbm_to_vmem [thread:$0]  %s1731_s0, 256, %s17_s16, [#allocation3], %s1175_s26, %s1175_s26, %s1176_s27  }
  0x13   :  { %1172 = dma.done.wait [#allocation3], 2048  }
  0x14   :  { %1173 = vsyncadd [#allocation3], 4294965248  ;;  %vm51_vm0 = vcmask 261120   ;;  %v46_v0 = vld [vmem:[%s1732_s1] sm:$0xff]  ;;  %v47_v1 = vld [vmem:[%s1732_s1 + $0x8] sm:$0xff]  ;;  %v331_v30 = vlaneseq }
  0x15   :  { %v48_v2 = vld [vmem:[%s1732_s1 + $0x10] sm:$0xff]  ;;  %v1126_v3 = vpack.c.bf16 %v47_v1, %v46_v0  ;;  %v49_v4 = vld [vmem:[%s1732_s1 + $0x18] sm:$0xff]  ;;  %v30_v5 = vld [vmem:[#allocation2] sm:$0xff] }
  0x16   :  { %v1130_v6 = vpack.c.bf16 %v49_v4, %v48_v2  ;;  %1070 = vmatprep.mubr.msk.f32.mxu0 %vm51_vm0, %v30_v5  ;;  %v31_v7 = vld [vmem:[#allocation2 + $0x8] sm:$0xff]  ;;  %v32_v8 = vld [vmem:[#allocation2 + $0x10] sm:$0xff]  ;;  %v33_v9 = vld [vmem:[#allocation2 + $0x18] sm:$0xff]  ;;  %v1253_v40 = vand.u32 127, %v331_v30 }
  0x17   :  { %1127 = vmatprep.subr.bf16.mxu0 %v1126_v3  ;;  %1142 = vmatprep.subr.bf16.mxu1 %v1126_v3  ;;  %v34_v10 = vld [vmem:[#allocation2 + $0x20] sm:$0xff]  ;;  %v35_v11 = vld [vmem:[#allocation2 + $0x28] sm:$0xff]  ;;  %v36_v12 = vld [vmem:[#allocation2 + $0x30] sm:$0xff] }
  0x18   :  { %1129 = vmatpush3.bf16.msra.mxu0 %v1126_v3  ;;  %1144 = vmatpush3.bf16.xpose.msra.mxu1 %v1126_v3  ;;  %v37_v13 = vld [vmem:[#allocation2 + $0x38] sm:$0xff]  ;;  %v38_v14 = vld [vmem:[#allocation2 + $0x40] sm:$0xff]  ;;  %v39_v15 = vld [vmem:[#allocation2 + $0x48] sm:$0xff] }
  0x19   :  { %1131 = vmatprep.subr.bf16.mxu0 %v1130_v6  ;;  %1143 = vmatprep.subr.bf16.mxu1 %v1130_v6  ;;  %v40_v16 = vld [vmem:[#allocation2 + $0x50] sm:$0xff]  ;;  %v41_v17 = vld [vmem:[#allocation2 + $0x58] sm:$0xff]  ;;  %v42_v18 = vld [vmem:[#allocation2 + $0x60] sm:$0xff] }
  0x1a   :  { %v43_v19 = vld [vmem:[#allocation2 + $0x68] sm:$0xff]  ;;  %v44_v20 = vld [vmem:[#allocation2 + $0x70] sm:$0xff]  ;;  %v45_v21 = vld [vmem:[#allocation2 + $0x78] sm:$0xff] }
  0x1b   :  { %v1246_v22 = vld [vmem:[%s1733_s2] ss:$0 sm:$0xff] }
  0x1c   :  { %1133 = vmatpush3.bf16.msra.mxu0 %v1130_v6 }
  0x1d   :  { %1135 = vmatprep.subr.bf16.mxu0 %v1126_v3 }
  0x1f   :  { %1071 = vmatmul.mubr.msk.f32.vlgmr.msra.gmra.mrb[0].mxu0 %vm51_vm0, %v31_v7 }
  0x20   :  { %1073 = vmatprep.mubr.msk.f32.mxu0 %vm51_vm0, %v32_v8  ;;  %1145 = vmatpush3.bf16.xpose.msra.mxu1 %v1130_v6 }
  0x23   :  { %1074 = vmatmul.mubr.msk.f32.gmra.mrb[2].mxu0 %vm51_vm0, %v33_v9 }
  0x24   :  { %1076 = vmatprep.mubr.msk.f32.mxu0 %vm51_vm0, %v34_v10 }
  0x25   :  { %1137 = vmatpush3.bf16.xpose.msra.mxu0 %v1126_v3 }
  0x26   :  { %1139 = vmatprep.subr.bf16.mxu0 %v1130_v6 }
  0x27   :  { %1077 = vmatmul.mubr.msk.f32.gmra.mrb[4].mxu0 %vm51_vm0, %v35_v11 }
  0x28   :  { %1079 = vmatprep.mubr.msk.f32.mxu0 %vm51_vm0, %v36_v12 }
  0x2b   :  { %1080 = vmatmul.mubr.msk.f32.gmra.mrb[6].mxu0 %vm51_vm0, %v37_v13 }
  0x2c   :  { %1082 = vmatprep.mubr.msk.f32.mxu0 %vm51_vm0, %v38_v14 }
  0x2d   :  { %1141 = vmatpush3.bf16.xpose.msra.mxu0 %v1130_v6 }
  0x2f   :  { %1083 = vmatmul.mubr.msk.f32.gmra.mrb[8].mxu0 %vm51_vm0, %v39_v15 }
  0x30   :  { %1085 = vmatprep.mubr.msk.f32.mxu0 %vm51_vm0, %v40_v16 }
  0x33   :  { %1086 = vmatmul.mubr.msk.f32.gmra.mrb[10].mxu0 %vm51_vm0, %v41_v17 }
  0x34   :  { %1088 = vmatprep.mubr.msk.f32.mxu0 %vm51_vm0, %v42_v18 }
  0x37   :  { %1089 = vmatmul.mubr.msk.f32.gmra.mrb[12].mxu0 %vm51_vm0, %v43_v19 }
  0x38   :  { %1091 = vmatprep.mubr.msk.f32.mxu0 %vm51_vm0, %v44_v20 }
  0x3b   :  { %1092 = vmatmul.mubr.msk.f32.gmra.mrb[14].mxu0 %vm51_vm0, %v45_v21 }
  0xf2   :  { %v1072_v23 = vpop.f32.mrb[0].mxu0 }
  0xf3   :  { %v252_v24 = vsub.f32 %v1246_v22, %v1072_v23  ;;  %v166_v25 = vpop.f32.mrb[1].mxu0 }
  0xf4   :  { %v251_v26 = vsub.f32 %v1246_v22, %v166_v25 }
  0xf5   :  { %v284_v27 = vshra.s32 %v252_v24, 31 }
  0xf6   :  { %v283_v28 = vshra.s32 %v251_v26, 31  ;;  %v1075_v29 = vpop.f32.mrb[2].mxu0 }
  0xf7   :  { %v254_v31 = vsub.f32 %v1246_v22, %v1075_v29  ;;  %v176_v32 = vpop.f32.mrb[3].mxu0  ;;  %v300_v35 = vand.u32 2147483647, %v284_v27 }
  0xf8   :  { %v299_v33 = vand.u32 2147483647, %v283_v28  ;;  %v253_v34 = vsub.f32 %v1246_v22, %v176_v32 }
  0xf9   :  { %v286_v36 = vshra.s32 %v254_v31, 31  ;;  %v316_v47 = vxor.u32 %v300_v35, %v252_v24 }
  0xfa   :  { %v315_v37 = vxor.u32 %v299_v33, %v251_v26  ;;  %v285_v38 = vshra.s32 %v253_v34, 31  ;;  %v1078_v39 = vpop.f32.mrb[4].mxu0 }
  0xfb   :  { %v302_v41 = vand.u32 2147483647, %v286_v36  ;;  %v256_v42 = vsub.f32 %v1246_v22, %v1078_v39  ;;  %v186_v43 = vpop.f32.mrb[5].mxu0  ;;  %v1262_v61 = vand.u32 4294967168, %v316_v47 }
  0xfc   :  { %v333_v44 = vand.u32 4294967168, %v315_v37  ;;  %v301_v45 = vand.u32 2147483647, %v285_v38  ;;  %v255_v46 = vsub.f32 %v1246_v22, %v186_v43 }
  0xfd   :  { %v318_v48 = vxor.u32 %v302_v41, %v254_v31  ;;  %v288_v49 = vshra.s32 %v256_v42, 31 }
  0xfe   :  { %v317_v50 = vxor.u32 %v301_v45, %v253_v34  ;;  %v287_v51 = vshra.s32 %v255_v46, 31  ;;  %v1081_v52 = vpop.f32.mrb[6].mxu0  ;;  %v1258_v53 = vor.u32 %v333_v44, %v1253_v40 }
  0xff   :  { %v336_v54 = vand.u32 4294967168, %v318_v48  ;;  %v304_v55 = vand.u32 2147483647, %v288_v49  ;;  %v258_v56 = vsub.f32 %v1246_v22, %v1081_v52  ;;  %v196_v57 = vpop.f32.mrb[7].mxu0 }
 0x100   :  { %v335_v58 = vand.u32 4294967168, %v317_v50  ;;  %v303_v59 = vand.u32 2147483647, %v287_v51  ;;  %v257_v60 = vsub.f32 %v1246_v22, %v196_v57  ;;  %v366_v5 = vshra.s32 %v1258_v53, 16 }
 0x101   :  { %v320_v62 = vxor.u32 %v304_v55, %v256_v42  ;;  %v290_v63 = vshra.s32 %v258_v56, 31  ;;  %v1265_v0 = vor.u32 %v336_v54, %v1253_v40 }
 0x102   :  { %v319_v1 = vxor.u32 %v303_v59, %v255_v46  ;;  %v289_v2 = vshra.s32 %v257_v60, 31  ;;  %v1084_v3 = vpop.f32.mrb[8].mxu0  ;;  %v1268_v4 = vor.u32 %v335_v58, %v1253_v40  ;;  %v1295_v43 = vcvt.s32.f32 %v366_v5 }
 0x103   :  { %v338_v6 = vand.u32 4294967168, %v320_v62  ;;  %v306_v7 = vand.u32 2147483647, %v290_v63  ;;  %v260_v8 = vsub.f32 %v1246_v22, %v1084_v3  ;;  %v206_v9 = vpop.f32.mrb[9].mxu0  ;;  %v408_v10 = vshra.s32 %v1265_v0, 16 }
 0x104   :  { %v337_v11 = vand.u32 4294967168, %v319_v1  ;;  %v305_v12 = vand.u32 2147483647, %v289_v2  ;;  %v259_v13 = vsub.f32 %v1246_v22, %v206_v9  ;;  %v394_v14 = vshra.s32 %v1268_v4, 16 }
 0x105   :  { %v322_v15 = vxor.u32 %v306_v7, %v258_v56  ;;  %v292_v16 = vshra.s32 %v260_v8, 31  ;;  %v1275_v17 = vcvt.s32.f32 %v408_v10  ;;  %v1278_v18 = vor.u32 %v338_v6, %v1253_v40 }
 0x106   :  { %v321_v19 = vxor.u32 %v305_v12, %v257_v60  ;;  %v291_v20 = vshra.s32 %v259_v13, 31  ;;  %v1087_v21 = vpop.f32.mrb[10].mxu0  ;;  %v1280_v23 = vcvt.s32.f32 %v394_v14  ;;  %v1283_v24 = vor.u32 %v337_v11, %v1253_v40 }
 0x107   :  { %v340_v25 = vand.u32 4294967168, %v322_v15  ;;  %v308_v26 = vand.u32 2147483647, %v292_v16  ;;  %411 = vmin.xlane.f32.xlu0 %v1275_v17  ;;  %v262_v27 = vsub.f32 %v1246_v22, %v1087_v21  ;;  %v216_v28 = vpop.f32.mrb[11].mxu0  ;;  %v436_v29 = vshra.s32 %v1278_v18, 16 }
 0x108   :  { %v339_v31 = vand.u32 4294967168, %v321_v19  ;;  %v307_v32 = vand.u32 2147483647, %v291_v20  ;;  %v261_v33 = vsub.f32 %v1246_v22, %v216_v28  ;;  %v422_v34 = vshra.s32 %v1283_v24, 16 }
 0x109   :  { %v324_v35 = vxor.u32 %v308_v26, %v260_v8  ;;  %v294_v36 = vshra.s32 %v262_v27, 31  ;;  %v1290_v37 = vcvt.s32.f32 %v436_v29  ;;  %v1293_v38 = vor.u32 %v340_v25, %v1253_v40 }
 0x10a   :  { %v323_v39 = vxor.u32 %v307_v32, %v259_v13  ;;  %v293_v41 = vshra.s32 %v261_v33, 31  ;;  %v1090_v42 = vpop.f32.mrb[12].mxu0  ;;  %v1298_v44 = vor.u32 %v339_v31, %v1253_v40  ;;  %v1306_v57 = vcvt.s32.f32 %v422_v34 }
 0x10b   :  { %v342_v45 = vand.u32 4294967168, %v324_v35  ;;  %v310_v46 = vand.u32 2147483647, %v294_v36  ;;  %397 = vmin.xlane.f32.xlu0 %v1280_v23  ;;  %439 = vmin.xlane.f32.xlu1 %v1290_v37  ;;  %v264_v47 = vsub.f32 %v1246_v22, %v1090_v42  ;;  %v226_v48 = vpop.f32.mrb[13].mxu0  ;;  %v464_v49 = vshra.s32 %v1293_v38, 16 }
 0x10c   :  { %v341_v50 = vand.u32 4294967168, %v323_v39  ;;  %v309_v51 = vand.u32 2147483647, %v293_v41  ;;  %v263_v52 = vsub.f32 %v1246_v22, %v226_v48  ;;  %v450_v54 = vshra.s32 %v1298_v44, 16 }
 0x10d   :  { %v326_v55 = vxor.u32 %v310_v46, %v262_v27  ;;  %v296_v56 = vshra.s32 %v264_v47, 31  ;;  %v1309_v58 = vor.u32 %v342_v45, %v1253_v40  ;;  %v1311_v63 = vcvt.s32.f32 %v464_v49 }
 0x10e   :  { %v325_v59 = vxor.u32 %v309_v51, %v261_v33  ;;  %v295_v60 = vshra.s32 %v263_v52, 31  ;;  %v1093_v62 = vpop.f32.mrb[14].mxu0  ;;  %v1314_v1 = vor.u32 %v341_v50, %v1253_v40  ;;  %v1319_v6 = vcvt.s32.f32 %v450_v54 }
 0x10f   :  { %v312_v2 = vand.u32 2147483647, %v296_v56  ;;  %369 = vmin.xlane.f32.xlu0 %v1295_v43  ;;  %425 = vmin.xlane.f32.xlu1 %v1306_v57  ;;  %v266_v3 = vsub.f32 %v1246_v22, %v1093_v62  ;;  %v236_v5 = vpop.f32.mrb[15].mxu0  ;;  %v492_v7 = vshra.s32 %v1309_v58, 16  ;;  %v344_v12 = vand.u32 4294967168, %v326_v55 }
 0x110   :  { %v343_v8 = vand.u32 4294967168, %v325_v59  ;;  %v311_v9 = vand.u32 2147483647, %v295_v60  ;;  %v265_v10 = vsub.f32 %v1246_v22, %v236_v5  ;;  %v478_v11 = vshra.s32 %v1314_v1, 16 }
 0x111   :  { %v328_v13 = vxor.u32 %v312_v2, %v264_v47  ;;  %v298_v14 = vshra.s32 %v266_v3, 31  ;;  %v1326_v15 = vor.u32 %v1262_v61, %v1253_v40  ;;  %v1333_v22 = vcvt.s32.f32 %v492_v7 }
 0x112   :  { %v327_v16 = vxor.u32 %v311_v9, %v263_v52  ;;  %v297_v19 = vshra.s32 %v265_v10, 31  ;;  %v1329_v20 = vor.u32 %v343_v8, %v1253_v40  ;;  %v1335_v26 = vcvt.s32.f32 %v478_v11 }
 0x113   :  { %v346_v21 = vand.u32 4294967168, %v328_v13  ;;  %v314_v25 = vand.u32 2147483647, %v298_v14  ;;  %467 = vmin.xlane.f32.xlu1 %v1311_v63  ;;  %453 = vmin.xlane.f32.xlu0 %v1319_v6  ;;  %v380_v31 = vshra.s32 %v1326_v15, 16  ;;  %v1340_v32 = vor.u32 %v344_v12, %v1253_v40 }
 0x114   :  { %v345_v27 = vand.u32 4294967168, %v327_v16  ;;  %v313_v28 = vand.u32 2147483647, %v297_v19  ;;  %v506_v61 = vshra.s32 %v1329_v20, 16  ;;  %v407_v60 = vand.u32 65535, %v1265_v0 }
 0x115   :  { %v330_v29 = vxor.u32 %v314_v25, %v266_v3  ;;  %v1350_v39 = vor.u32 %v346_v21, %v1253_v40  ;;  %v1353_v45 = vcvt.s32.f32 %v380_v31  ;;  %v520_v46 = vshra.s32 %v1340_v32, 16 }
 0x116   :  { %v329_v33 = vxor.u32 %v313_v28, %v265_v10  ;;  %v1343_v34 = vor.u32 %v345_v27, %v1253_v40  ;;  %v1347_v36 = vcvt.s32.f32 %v506_v61  ;;  %v409_v2 = vcvt.s32.f32 %v407_v60 }
 0x117   :  { %v348_v35 = vand.u32 4294967168, %v330_v29  ;;  %495 = vmin.xlane.f32.xlu1 %v1333_v22  ;;  %481 = vmin.xlane.f32.xlu0 %v1335_v26  ;;  %v548_v49 = vshra.s32 %v1350_v39, 16  ;;  %v1368_v52 = vcvt.s32.f32 %v520_v46  ;;  %v435_v3 = vand.u32 65535, %v1278_v18 }
 0x118   :  { %v347_v41 = vand.u32 4294967168, %v329_v33  ;;  %v534_v42 = vshra.s32 %v1343_v34, 16  ;;  %v365_v10 = vand.u32 65535, %v1258_v53  ;;  %v393_v13 = vand.u32 65535, %v1268_v4 }
 0x119   :  { %v1365_v50 = vor.u32 %v348_v35, %v1253_v40  ;;  %v1372_v54 = vcvt.s32.f32 %v548_v49  ;;  %v437_v9 = vcvt.s32.f32 %v435_v3  ;;  %v491_v21 = vand.u32 65535, %v1309_v58 }
 0x11a   :  { %v1357_v47 = vor.u32 %v347_v41, %v1253_v40  ;;  %v1361_v48 = vcvt.s32.f32 %v534_v42  ;;  %v367_v12 = vcvt.s32.f32 %v365_v10  ;;  %v395_v19 = vcvt.s32.f32 %v393_v13 }
 0x11b   :  { %383 = vmin.xlane.f32.xlu0 %v1353_v45  ;;  %509 = vmin.xlane.f32.xlu1 %v1347_v36  ;;  %v576_v56 = vshra.s32 %v1365_v50, 16  ;;  %v493_v27 = vcvt.s32.f32 %v491_v21  ;;  %v505_v58 = vand.u32 65535, %v1329_v20  ;;  %v519_v20 = vand.u32 65535, %v1340_v32 }
 0x11c   :  { %v562_v51 = vshra.s32 %v1357_v47, 16  ;;  %v547_v46 = vand.u32 65535, %v1350_v39  ;;  %v379_v32 = vand.u32 65535, %v1326_v15  ;;  %v575_v39 = vand.u32 65535, %v1365_v50 }
 0x11d   :  { %v1379_v59 = vcvt.s32.f32 %v576_v56  ;;  %v507_v31 = vcvt.s32.f32 %v505_v58  ;;  %v521_v41 = vcvt.s32.f32 %v519_v20  ;;  %v533_v15 = vand.u32 65535, %v1343_v34 }
 0x11e   :  { %v1374_v55 = vcvt.s32.f32 %v562_v51  ;;  %v549_v51 = vcvt.s32.f32 %v547_v46  ;;  %v381_v56 = vcvt.s32.f32 %v379_v32  ;;  %v577_v3 = vcvt.s32.f32 %v575_v39 }
 0x11f   :  { %523 = vmin.xlane.f32.xlu1 %v1368_v52  ;;  %537 = vmin.xlane.f32.xlu0 %v1361_v48  ;;  %v561_v50 = vand.u32 65535, %v1357_v47  ;;  %v1467_v47 = vadd.s32 4294967272, %v1253_v40  ;;  %v1500_v32 = vadd.s32 4294967240, %v1253_v40  ;;  %v1177_v39 = vmov 1.0  }
 0x123   :  { %551 = vmin.xlane.f32.xlu1 %v1372_v54  ;;  %565 = vmin.xlane.f32.xlu0 %v1374_v55 }
 0x127   :  { %579 = vmin.xlane.f32.xlu1 %v1379_v59 }
 0x194   :  { %v1383_v62 = vpop.xlane.xlu0 %411 }
 0x195   :  { %vm413_vm1 = vcmp.eq.f32.partialorder %v1275_v17, %v1383_v62  ;;  %v463_v17 = vand.u32 65535, %v1293_v38  ;;  %v421_v38 = vand.u32 65535, %v1283_v24  ;;  %v449_v24 = vand.u32 65535, %v1298_v44 }
 0x196   :  { %v414_v5 = vsel %vm413_vm1, %v409_v2, inf  ;;  %v477_v44 = vand.u32 65535, %v1314_v1 }
 0x197   :  { %415 = vmin.xlane.f32.xlu1 %v414_v5  ;;  %v465_v16 = vcvt.s32.f32 %v463_v17  ;;  %v423_v28 = vcvt.s32.f32 %v421_v38  ;;  %v451_v33 = vcvt.s32.f32 %v449_v24  ;;  %v535_v5 = vcvt.s32.f32 %v533_v15 }
 0x198   :  { %v1388_v7 = vpop.xlane.xlu0 %397  ;;  %v1390_v8 = vpop.xlane.xlu1 %439  ;;  %v479_v42 = vcvt.s32.f32 %v477_v44 }
 0x199   :  { %vm441_vm2 = vcmp.eq.f32.partialorder %v1290_v37, %v1390_v8  ;;  %vm399_vm4 = vcmp.eq.f32.partialorder %v1280_v23, %v1388_v7  ;;  %v446_v13 = vcvt.f32.s32 %v1390_v8 }
 0x19a   :  { %v442_v0 = vsel %vm441_vm2, %v437_v9, inf  ;;  %v563_v9 = vcvt.s32.f32 %v561_v50 }
 0x19b   :  { %443 = vmin.xlane.f32.xlu1 %v442_v0  ;;  %v418_v0 = vcvt.f32.s32 %v1383_v62 }
 0x19c   :  { %v1395_v11 = vpop.xlane.xlu0 %369  ;;  %v1397_v18 = vpop.xlane.xlu1 %425 }
 0x19d   :  { %vm371_vm3 = vcmp.eq.f32.partialorder %v1295_v43, %v1395_v11  ;;  %v400_v43 = vsel %vm399_vm4, %v395_v19, inf  ;;  %vm427_vm6 = vcmp.eq.f32.partialorder %v1306_v57, %v1397_v18  ;;  %v376_v17 = vcvt.f32.s32 %v1395_v11 }
 0x19e   :  { %v372_v14 = vsel %vm371_vm3, %v367_v12, inf  ;;  %v428_v61 = vsel %vm427_vm6, %v423_v28, inf  ;;  %v1464_v12 = vshrl.u32 %v331_v30, 7  ;;  %v419_v19 = vshll.u32 %v418_v0, 16 }
 0x19f   :  { %373 = vmin.xlane.f32.xlu0 %v372_v14 }
 0x1a0   :  { %v1405_v53 = vpop.xlane.xlu1 %467  ;;  %v1407_v37 = vpop.xlane.xlu0 %453  ;;  %v835_v21 = vsub.s32 %v1467_v47, %v1464_v12 }
 0x1a1   :  { %vm469_vm5 = vcmp.eq.f32.partialorder %v1311_v63, %v1405_v53  ;;  %vm455_vm8 = vcmp.eq.f32.partialorder %v1319_v6, %v1407_v37  ;;  %v474_v14 = vcvt.f32.s32 %v1405_v53 }
 0x1a2   :  { %v470_v4 = vsel %vm469_vm5, %v465_v16, inf  ;;  %v456_v35 = vsel %vm455_vm8, %v451_v33, inf  ;;  %v460_v16 = vcvt.f32.s32 %v1407_v37 }
 0x1a3   :  { %471 = vmin.xlane.f32.xlu1 %v470_v4  ;;  %401 = vmin.xlane.f32.xlu0 %v400_v43  ;;  %v377_v43 = vshll.u32 %v376_v17, 16  ;;  %v475_v28 = vshll.u32 %v474_v14, 16 }
 0x1a4   :  { %v1415_v23 = vpop.xlane.xlu1 %495  ;;  %v1417_v25 = vpop.xlane.xlu0 %481 }
 0x1a5   :  { %vm497_vm7 = vcmp.eq.f32.partialorder %v1333_v22, %v1415_v23  ;;  %vm483_vm10 = vcmp.eq.f32.partialorder %v1335_v26, %v1417_v25  ;;  %v502_v62 = vcvt.f32.s32 %v1415_v23  ;;  %v488_v30 = vcvt.f32.s32 %v1417_v25 }
 0x1a6   :  { %v498_v63 = vsel %vm497_vm7, %v493_v27, inf  ;;  %v484_v49 = vsel %vm483_vm10, %v479_v42, inf  ;;  %v447_v27 = vshll.u32 %v446_v13, 16  ;;  %v461_v23 = vshll.u32 %v460_v16, 16 }
 0x1a7   :  { %499 = vmin.xlane.f32.xlu1 %v498_v63  ;;  %429 = vmin.xlane.f32.xlu0 %v428_v61  ;;  %v503_v58 = vshll.u32 %v502_v62, 16  ;;  %v1482_v25 = vadd.s32 4294967256, %v1253_v40  ;;  %v1486_v63 = vshll.u32 %v488_v30, 16  ;;  %vm830_vm10 = vcmask 195712  }
 0x1a8   :  { %v1425_v57 = vpop.xlane.xlu0 %383  ;;  %v1427_v29 = vpop.xlane.xlu1 %509 }
 0x1a9   :  { %vm511_vm9 = vcmp.eq.f32.partialorder %v1347_v36, %v1427_v29  ;;  %vm385_vm12 = vcmp.eq.f32.partialorder %v1353_v45, %v1425_v57  ;;  %v390_v8 = vcvt.f32.s32 %v1425_v57  ;;  %v516_v37 = vcvt.f32.s32 %v1427_v29 }
 0x1aa   :  { %v512_v22 = vsel %vm511_vm9, %v507_v31, inf  ;;  %v386_v60 = vsel %vm385_vm12, %v381_v56, inf  ;;  %vm823_vm9 = vcmask 130112   ;;  %vm844_vm12 = vcmask 326912  }
 0x1ab   :  { %513 = vmin.xlane.f32.xlu1 %v512_v22  ;;  %457 = vmin.xlane.f32.xlu0 %v456_v35  ;;  %v1491_v44 = vshll.u32 %v390_v8, 16  ;;  %v517_v35 = vshll.u32 %v516_v37, 16  ;;  %v1564_v8 = vadd.s32 4294967232, %v1253_v40 }
 0x1ac   :  { %v1435_v6 = vpop.xlane.xlu1 %523  ;;  %v1441_v1 = vpop.xlane.xlu0 %537 }
 0x1ad   :  { %vm525_vm11 = vcmp.eq.f32.partialorder %v1368_v52, %v1435_v6  ;;  %vm539_vm14 = vcmp.eq.f32.partialorder %v1361_v48, %v1441_v1  ;;  %v530_v61 = vcvt.f32.s32 %v1435_v6  ;;  %v849_v6 = vsub.s32 %v1482_v25, %v1464_v12 }
 0x1ae   :  { %v526_v36 = vsel %vm525_vm11, %v521_v41, inf  ;;  %v544_v41 = vcvt.f32.s32 %v1441_v1  ;;  %vm837_vm11 = vcmask 261312  }
 0x1af   :  { %527 = vmin.xlane.f32.xlu1 %v526_v36  ;;  %485 = vmin.xlane.f32.xlu0 %v484_v49  ;;  %v531_v49 = vshll.u32 %v530_v61, 16 }
 0x1b0   :  { %v1445_v26 = vpop.xlane.xlu1 %551  ;;  %v1453_v2 = vpop.xlane.xlu0 %565 }
 0x1b1   :  { %vm553_vm13 = vcmp.eq.f32.partialorder %v1372_v54, %v1445_v26  ;;  %v540_v54 = vsel %vm539_vm14, %v535_v5, inf  ;;  %vm567_vm1 = vcmp.eq.f32.partialorder %v1374_v55, %v1453_v2  ;;  %v432_v55 = vcvt.f32.s32 %v1397_v18 }
 0x1b2   :  { %v554_v52 = vsel %vm553_vm13, %v549_v51, inf  ;;  %v568_v48 = vsel %vm567_vm1, %v563_v9, inf  ;;  %v558_v42 = vcvt.f32.s32 %v1445_v26  ;;  %v572_v46 = vcvt.f32.s32 %v1453_v2 }
 0x1b3   :  { %555 = vmin.xlane.f32.xlu1 %v554_v52  ;;  %387 = vmin.xlane.f32.xlu0 %v386_v60  ;;  %v433_v53 = vshll.u32 %v432_v55, 16  ;;  %v1513_v60 = vadd.s32 4294967224, %v1253_v40  ;;  %v1516_v5 = vshll.u32 %v544_v41, 16  ;;  %v1527_v9 = vadd.s32 4294967264, %v1253_v40 }
 0x1b4   :  { %v1455_v45 = vpop.xlane.xlu1 %579  ;;  %v1518_v50 = vshll.u32 %v558_v42, 16  ;;  %v870_v42 = vsub.s32 %v1564_v8, %v1464_v12  ;;  %vm851_vm13 = vcmask 392512   ;;  %vm858_vm1 = vcmask 458112  }
 0x1b5   :  { %vm581_vm15 = vcmp.eq.f32.partialorder %v1379_v59, %v1455_v45  ;;  %v404_v59 = vcvt.f32.s32 %v1388_v7  ;;  %v586_v51 = vcvt.f32.s32 %v1455_v45  ;;  %v1520_v45 = vshll.u32 %v572_v46, 16 }
 0x1b6   :  { %v582_v34 = vsel %vm581_vm15, %v577_v3, inf  ;;  %v877_v14 = vsub.s32 %v1513_v60, %v1464_v12 }
 0x1b7   :  { %583 = vmin.xlane.f32.xlu1 %v582_v34  ;;  %541 = vmin.xlane.f32.xlu0 %v540_v54  ;;  %v405_v11 = vshll.u32 %v404_v59, 16  ;;  %v816_v34 = vsub.s32 %v1253_v40, %v1464_v12  ;;  %v863_v54 = vsub.s32 %v1500_v32, %v1464_v12 }
 0x1bb   :  { %569 = vmin.xlane.f32.xlu0 %v568_v48 }
 0x224   :  { %v416_v10 = vpop.xlane.xlu1 %415 }
 0x225   :  { %v417_v38 = vcvt.f32.s32 %v416_v10  ;;  %v1534_v10 = vshll.u32 %v586_v51, 16 }
 0x227   :  { %v1489_v31 = vadd.s32 %v419_v19, %v417_v38  ;;  %v1548_v19 = vadd.s32 4294967216, %v1253_v40  ;;  %v1551_v38 = vadd.s32 4294967280, %v1253_v40 }
 0x228   :  { %v444_v7 = vpop.xlane.xlu1 %443 }
 0x229   :  { %v445_v57 = vcvt.f32.s32 %v444_v7  ;;  %v592_v1 = vand.u32 127, %v1489_v31  ;;  %v1554_v7 = vadd.s32 4294967248, %v1253_v40 }
 0x22b   :  { %v1509_v26 = vadd.s32 %v447_v27, %v445_v57  ;;  %vm608_vm4 = vcmp.eq.s32.totalorder %v1253_v40, %v592_v1  ;;  %v884_v57 = vsub.s32 %v1548_v19, %v1464_v12 }
 0x22c   :  { %v374_v4 = vpop.xlane.xlu0 %373 }
 0x22d   :  { %v375_v18 = vcvt.f32.s32 %v374_v4  ;;  %v594_v0 = vand.u32 127, %v1509_v26  ;;  %v842_v4 = vsub.s32 %v1527_v9, %v1464_v12  ;;  %v909_v9 = vadd.s32 4294967184, %v1253_v40 }
 0x22f   :  { %v1484_v24 = vadd.s32 %v377_v43, %v375_v18  ;;  %v1561_v43 = vadd.s32 4294967208, %v1253_v40  ;;  %vm610_vm6 = vcmp.eq.s32.totalorder %v1253_v40, %v594_v0 }
 0x230   :  { %v472_v33 = vpop.xlane.xlu1 %471  ;;  %v402_v20 = vpop.xlane.xlu0 %401 }
 0x231   :  { %v589_v29 = vand.u32 127, %v1484_v24  ;;  %v403_v22 = vcvt.f32.s32 %v402_v20  ;;  %v473_v52 = vcvt.f32.s32 %v472_v33  ;;  %v828_v20 = vsub.s32 %v1551_v38, %v1464_v12 }
 0x232   :  { %v891_v41 = vsub.s32 %v1561_v43, %v1464_v12 }
 0x233   :  { %v1502_v36 = vadd.s32 %v405_v11, %v403_v22  ;;  %vm605_vm2 = vcmp.eq.s32.totalorder %v1253_v40, %v589_v29  ;;  %v1541_v55 = vadd.s32 %v475_v28, %v473_v52  ;;  %v1575_v28 = vadd.s32 4294967192, %v1253_v40 }
 0x234   :  { %v500_v56 = vpop.xlane.xlu1 %499  ;;  %1102 = vmatprep.mubr.msk.f32.mxu0 %vm605_vm2, %v1177_v39  ;;  %v430_v15 = vpop.xlane.xlu0 %429  ;;  %v856_v22 = vsub.s32 %v1554_v7, %v1464_v12  ;;  %vm865_vm2 = vcmask 523712  }
 0x235   :  { %v431_v2 = vcvt.f32.s32 %v430_v15  ;;  %v591_v3 = vand.u32 127, %v1502_v36  ;;  %v501_v59 = vcvt.f32.s32 %v500_v56  ;;  %v596_v37 = vand.u32 127, %v1541_v55 }
 0x236   :  { %v905_v15 = vsub.s32 %v1575_v28, %v1464_v12 }
 0x237   :  { %v1529_v48 = vadd.s32 %v433_v53, %v431_v2  ;;  %vm607_vm3 = vcmp.eq.s32.totalorder %v1253_v40, %v591_v3  ;;  %v1566_v18 = vadd.s32 %v503_v58, %v501_v59  ;;  %vm612_vm8 = vcmp.eq.s32.totalorder %v1253_v40, %v596_v37 }
 0x238   :  { %v514_v17 = vpop.xlane.xlu1 %513  ;;  %1105 = vmatprep.mubr.msk.f32.mxu1 %vm607_vm3, %v1177_v39  ;;  %v458_v13 = vpop.xlane.xlu0 %457  ;;  %vm872_vm3 = vcmask 589312  }
 0x239   :  { %v593_v16 = vand.u32 127, %v1529_v48  ;;  %v459_v62 = vcvt.f32.s32 %v458_v13  ;;  %1106 = vmatmul.mubr.msk.f32.vlgmr.msra.gmra.mrb[0].mxu1 %vm608_vm4, %v1177_v39  ;;  %v515_v30 = vcvt.f32.s32 %v514_v17  ;;  %v598_v51 = vand.u32 127, %v1566_v18 }
 0x23b   :  { %v1558_v11 = vadd.s32 %v461_v23, %v459_v62  ;;  %vm609_vm5 = vcmp.eq.s32.totalorder %v1253_v40, %v593_v16  ;;  %v1582_v33 = vadd.s32 %v517_v35, %v515_v30  ;;  %v818_v35 = vadd.s32 4294967288, %v1253_v40 }
 0x23c   :  { %v528_v27 = vpop.xlane.xlu1 %527  ;;  %v486_v53 = vpop.xlane.xlu0 %485  ;;  %1108 = vmatprep.mubr.msk.f32.mxu1 %vm609_vm5, %v1177_v39  ;;  %v1615_v30 = vadd.s32 4294967176, %v1253_v40  ;;  %vm614_vm15 = vcmp.eq.s32.totalorder %v1253_v40, %v598_v51  ;;  %v878_v7 = vrot.slane %v598_v51, %v877_v14 }
 0x23d   :  { %v595_v23 = vand.u32 127, %v1558_v11  ;;  %v529_v61 = vcvt.f32.s32 %v528_v27  ;;  %v487_v58 = vcvt.f32.s32 %v486_v53  ;;  %1109 = vmatmul.mubr.msk.f32.gmra.mrb[2].mxu1 %vm610_vm6, %v1177_v39  ;;  %v821_v13 = vsub.s32 %v818_v35, %v1464_v12 }
 0x23f   :  { %v1594_v46 = vadd.s32 %v1486_v63, %v487_v58  ;;  %v1598_v56 = vadd.s32 %v531_v49, %v529_v61  ;;  %vm611_vm7 = vcmp.eq.s32.totalorder %v1253_v40, %v595_v23  ;;  %v599_v49 = vand.u32 127, %v1582_v33 }
 0x240   :  { %v556_v52 = vpop.xlane.xlu1 %555  ;;  %v388_v2 = vpop.xlane.xlu0 %387  ;;  %1111 = vmatprep.mubr.msk.f32.mxu1 %vm611_vm7, %v1177_v39  ;;  %v857_v25 = vrot.slane %v595_v23, %v856_v22 }
 0x241   :  { %v597_v59 = vand.u32 127, %v1594_v46  ;;  %v557_v17 = vcvt.f32.s32 %v556_v52  ;;  %v389_v63 = vcvt.f32.s32 %v388_v2  ;;  %1112 = vmatmul.mubr.msk.f32.gmra.mrb[4].mxu1 %vm612_vm8, %v1177_v39  ;;  %v600_v38 = vand.u32 127, %v1598_v56 }
 0x242   :  { %vm615_vm4 = vcmp.eq.s32.totalorder %v1253_v40, %v599_v49  ;;  %v919_v2 = vsub.s32 %v1615_v30, %v1464_v12  ;;  %v885_v11 = vrot.slane %v599_v49, %v884_v57 }
 0x243   :  { %v392_v62 = vadd.s32 %v1491_v44, %v389_v63  ;;  %vm613_vm14 = vcmp.eq.s32.totalorder %v1253_v40, %v597_v59  ;;  %v1625_v61 = vadd.s32 %v1518_v50, %v557_v17  ;;  %v817_v50 = vrot.slane %v589_v29, %v816_v34 }
 0x244   :  { %v584_v27 = vpop.xlane.xlu1 %583  ;;  %v542_v53 = vpop.xlane.xlu0 %541  ;;  %1114 = vmatprep.mubr.msk.f32.mxu1 %vm613_vm14, %v1177_v39  ;;  %v836_v17 = vrot.slane %v592_v1, %v835_v21  ;;  %v829_v63 = vrot.slane %v591_v3, %v828_v20  ;;  %vm616_vm6 = vcmp.eq.s32.totalorder %v1253_v40, %v600_v38  ;;  %v843_v21 = vrot.slane %v593_v16, %v842_v4 }
 0x245   :  { %v590_v44 = vand.u32 127, %v392_v62  ;;  %v585_v58 = vcvt.f32.s32 %v584_v27  ;;  %v543_v35 = vcvt.f32.s32 %v542_v53  ;;  %1115 = vmatmul.mubr.msk.f32.gmra.mrb[6].mxu1 %vm614_vm15, %v1177_v39  ;;  %v602_v34 = vand.u32 127, %v1625_v61 }
 0x246   :  { %1117 = vmatprep.mubr.msk.f32.mxu1 %vm615_vm4, %v1177_v39  ;;  %v895_v1 = vadd.s32 4294967200, %v1253_v40  ;;  %v864_v16 = vrot.slane %v596_v37, %v863_v54  ;;  %v871_v32 = vrot.slane %v597_v59, %v870_v42  ;;  %v912_v37 = vsub.s32 %v909_v9, %v1464_v12 }
 0x247   :  { %vm606_vm5 = vcmp.eq.s32.totalorder %v1253_v40, %v590_v44  ;;  %v822_v52 = vrot.slane %v590_v44, %v821_v13  ;;  %v546_v24 = vadd.s32 %v1516_v5, %v543_v35  ;;  %v588_v47 = vadd.s32 %v1534_v10, %v585_v58 }
 0x248   :  { %1103 = vmatmul.mubr.msk.f32.vlgmr.msra.gmra.mrb[16].mxu0 %vm606_vm5, %v1177_v39  ;;  %v570_v29 = vpop.xlane.xlu0 %569  ;;  %v850_v5 = vrot.slane %v594_v0, %v849_v6  ;;  %vm618_vm8 = vcmp.eq.s32.totalorder %v1253_v40, %v602_v34  ;;  %v898_v55 = vsub.s32 %v895_v1, %v1464_v12  ;;  %v892_v60 = vrot.slane %v600_v38, %v891_v41 }
 0x249   :  { %v824_v13 = vsel %vm823_vm9, %v822_v52, %v817_v50  ;;  %v571_v31 = vcvt.f32.s32 %v570_v29  ;;  %v601_v3 = vand.u32 127, %v546_v24  ;;  %1118 = vmatmul.mubr.msk.f32.gmra.mrb[8].mxu1 %vm616_vm6, %v1177_v39  ;;  %v604_v0 = vand.u32 127, %v588_v47 }
 0x24a   :  { %v831_v36 = vsel %vm830_vm10, %v829_v63, %v824_v13  ;;  %vm879_vm9 = vcmask 654912   ;;  %vm886_vm10 = vcmask 720512   ;;  %vm907_vm15 = vcmask 917312  }
 0x24b   :  { %v838_v10 = vsel %vm837_vm11, %v836_v17, %v831_v36  ;;  %v574_v48 = vadd.s32 %v1520_v45, %v571_v31  ;;  %vm617_vm7 = vcmp.eq.s32.totalorder %v1253_v40, %v601_v3  ;;  %vm620_vm14 = vcmp.eq.s32.totalorder %v1253_v40, %v604_v0 }
 0x24c   :  { %v845_v6 = vsel %vm844_vm12, %v843_v21, %v838_v10  ;;  %1120 = vmatprep.mubr.msk.f32.mxu1 %vm617_vm7, %v1177_v39  ;;  %vm893_vm12 = vcmask 786112   ;;  %v899_v18 = vrot.slane %v601_v3, %v898_v55  ;;  %v906_v23 = vrot.slane %v602_v34, %v905_v15 }
 0x24d   :  { %v852_v26 = vsel %vm851_vm13, %v850_v5, %v845_v6  ;;  %v603_v45 = vand.u32 127, %v574_v48  ;;  %1121 = vmatmul.mubr.msk.f32.gmra.mrb[10].mxu1 %vm618_vm8, %v1177_v39  ;;  %vm900_vm13 = vcmask 851712   ;;  %v920_v20 = vrot.slane %v604_v0, %v919_v2 }
 0x24e   :  { %v859_v54 = vsel %vm858_vm1, %v857_v25, %v852_v26  ;;  %vm914_vm1 = vcmask 982912  }
 0x24f   :  { %v866_v4 = vsel %vm865_vm2, %v864_v16, %v859_v54  ;;  %vm619_vm11 = vcmp.eq.s32.totalorder %v1253_v40, %v603_v45  ;;  %vm921_vm2 = vcmask 1048512   ;;  %v913_v43 = vrot.slane %v603_v45, %v912_v37 }
 0x250   :  { %v873_v8 = vsel %vm872_vm3, %v871_v32, %v866_v4  ;;  %1123 = vmatprep.mubr.msk.f32.mxu1 %vm619_vm11, %v1177_v39 }
 0x251   :  { %v880_v14 = vsel %vm879_vm9, %v878_v7, %v873_v8  ;;  %1124 = vmatmul.mubr.msk.f32.gmra.mrb[12].mxu1 %vm620_vm14, %v1177_v39 }
 0x252   :  { %v887_v19 = vsel %vm886_vm10, %v885_v11, %v880_v14 }
 0x253   :  { %v894_v57 = vsel %vm893_vm12, %v892_v60, %v887_v19 }
 0x254   :  { %v901_v33 = vsel %vm900_vm13, %v899_v18, %v894_v57 }
 0x255   :  { %v908_v22 = vsel %vm907_vm15, %v906_v23, %v901_v33 }
 0x256   :  { %v915_v41 = vsel %vm914_vm1, %v913_v43, %v908_v22 }
 0x257   :  { %v922_v42 = vsel %vm921_vm2, %v920_v20, %v915_v41 }
 0x258   :  { %923 = vst [vmem:[%s1735_s4] sm:$0x1] %v922_v42 }
 0x30c   :  { %v1107_v40 = vpop.f32.mrb[0].mxu1 }
 0x30d   :  { %v729_v46 = vpop.f32.mrb[1].mxu1 }
 0x310   :  { %v1110_v39 = vpop.f32.mrb[2].mxu1 }
 0x311   :  { %v739_v51 = vpop.f32.mrb[3].mxu1 }
 0x314   :  { %v1113_v56 = vpop.f32.mrb[4].mxu1 }
 0x315   :  { %v749_v12 = vpop.f32.mrb[5].mxu1 }
 0x318   :  { %v1116_v28 = vpop.f32.mrb[6].mxu1 }
 0x319   :  { %v759_v15 = vpop.f32.mrb[7].mxu1 }
 0x31b   :  { %v1104_v59 = vpop.f32.mrb[16].mxu0 }
 0x31c   :  { %799 = vst.msk [vmem:[#allocation4 + $0x8] sm:$0xff] %vm51_vm0, %v1104_v59  ;;  %v719_v49 = vpop.f32.mrb[17].mxu0  ;;  %v1119_v62 = vpop.f32.mrb[8].mxu1 }
 0x31d   :  { %798 = vst.msk [vmem:[#allocation4] sm:$0xff] %vm51_vm0, %v719_v49  ;;  %v769_v30 = vpop.f32.mrb[9].mxu1 }
 0x320   :  { %v1122_v38 = vpop.f32.mrb[10].mxu1 }
 0x321   :  { %v779_v27 = vpop.f32.mrb[11].mxu1 }
 0x323   :  { %v957_v53 = vld [vmem:[#allocation4 + $0x8] sm:$0xff] }
 0x324   :  { %958 = vst [vmem:[%s1734_s3 + $0x8] sm:$0xff] %v957_v53  ;;  %v955_v61 = vld [vmem:[#allocation4] sm:$0xff]  ;;  %v1125_v44 = vpop.f32.mrb[12].mxu1 }
 0x325   :  { %956 = vst [vmem:[%s1734_s3] sm:$0xff] %v955_v61  ;;  %v789_v58 = vpop.f32.mrb[13].mxu1 }
 0x326   :  { %968 = vsyncpa [#allocation3], 1 }

</bundles_post_ra>
